<compile_context>
chip_gen: v7x
topology: tpu7x:2x2x1
jax: 0.10.0
libtpu: 0.0.40
codegen_flags: <defaults>
</compile_context>

<pallas_src>
import functools

import jax
import jax.numpy as jnp
from jax import lax
from jax.experimental import pallas as pl
from jax.experimental.pallas import tpu as pltpu


# ---------------------------------------------------------------------------
# Fused Pallas kernel: 2 stacked LSTM layers + Linear head
# ---------------------------------------------------------------------------
def fused_lstm_kernel(x_ref, wx0_ref, wh0_ref, b0_ref,
                      wx1_ref, wh1_ref, b1_ref,
                      lin_w_ref, lin_b_ref, out_ref,
                      gx_ref, h1_ref, state_ref, *, t_blk, n_rows, hid):
    """x_ref:(t_blk*N, F)  wx0:(F,4H)  wh*:(H,4H)  wx1:(H,4H)  b*:(1,4H)
    lin_w:(H,O)  lin_b:(1,O)  out_ref:(t_blk*N, O)
    gx_ref:(t_blk*N,4H) scratch, h1_ref:(t_blk*N,H) scratch,
    state_ref:(4,N,H) scratch = [h0,c0,h1,c1] carried across grid steps.
    Gate column order i,f,g,o (PyTorch)."""

    # reset_hidden_state(): zero h/c before the first time-block only.
    @pl.when(pl.program_id(0) == 0)
    def _():
        state_ref[...] = jnp.zeros_like(state_ref)

    # ---- Hoisted layer-0 input projection for every timestep in this block ----
    # One MXU matmul with M = t_blk*N rows (instead of per-step tiny matmuls).
    gx_ref[...] = (jnp.dot(x_ref[...], wx0_ref[...],
                           preferred_element_type=jnp.float32) + b0_ref[...])

    # Hoist weight loads out of the (unrolled) time loop.
    wh0 = wh0_ref[...]
    wx1 = wx1_ref[...]
    wh1 = wh1_ref[...]
    b1 = b1_ref[...]

    def sigmoid(z):
        # One EUP op (tanh) per gate instead of exp + divide.
        return 0.5 * jnp.tanh(0.5 * z) + 0.5

    def cell_epilogue(gates, c_prev):
        # gates: (N, 4H) lane-dense MXU output; static lane slices per gate.
        i = sigmoid(gates[:, 0 * hid:1 * hid])
        f = sigmoid(gates[:, 1 * hid:2 * hid])
        g = jnp.tanh(gates[:, 2 * hid:3 * hid])
        o = sigmoid(gates[:, 3 * hid:4 * hid])
        c_new = f * c_prev + i * g
        h_new = o * jnp.tanh(c_new)
        return h_new, c_new

    def step(t, carry):
        h0, c0, h1, c1 = carry
        row = pl.multiple_of(t * n_rows, n_rows)
        # Layer 0: precomputed x-projection + ONE fused (H,4H) recurrent matmul.
        gates0 = gx_ref[pl.ds(row, n_rows), :] + jnp.dot(
            h0, wh0, preferred_element_type=jnp.float32)
        h0, c0 = cell_epilogue(gates0, c0)
        # TODO(synk): nn.LSTM inter-layer dropout (p=0.5) is train-only; eval forward is identity.
        # Layer 1: fused (H,4H) input + (H,4H) recurrent matmuls.
        gates1 = (jnp.dot(h0, wx1, preferred_element_type=jnp.float32)
                  + jnp.dot(h1, wh1, preferred_element_type=jnp.float32) + b1)
        h1, c1 = cell_epilogue(gates1, c1)
        h1_ref[pl.ds(row, n_rows), :] = h1   # stash for the batched Linear head
        return h0, c0, h1, c1

    carry0 = (state_ref[0], state_ref[1], state_ref[2], state_ref[3])
    h0, c0, h1, c1 = lax.fori_loop(
        0, t_blk, step, carry0,
        unroll=t_blk if t_blk <= 16 else 8)   # bounded unroll for large blocks

    # Carry the recurrent state to the next time-block.
    state_ref[0] = h0
    state_ref[1] = c0
    state_ref[2] = h1
    state_ref[3] = c1

    # ---- Batched Linear head over the whole block: one matmul, one store ----
    out_ref[...] = (jnp.dot(h1_ref[...], lin_w_ref[...],
                            preferred_element_type=jnp.float32)
                    + lin_b_ref[...]).astype(out_ref.dtype)


# ---------------------------------------------------------------------------
# Wrapper
# ---------------------------------------------------------------------------
def _wt(w):
    """PyTorch (4H, K), gates i,f,g,o stacked along rows -> (K, 4H) = W^T."""
    return jnp.asarray(w, jnp.float32).T


def _pick_t_block(T):
    for cand in (64, 32, 16, 8, 4, 2, 1):
        if cand <= T and T % cand == 0:
            return cand
    return 1


def lstm_model_forward(sequences, params, *, n_hidden, seq_len, n_layers=2):
    """Reproduces lstm.forward() with self.hidden = zeros (reset_hidden_state)."""
    assert n_layers == 2, "fused kernel is specialized to the module default n_layers=2"
    B = sequences.shape[0]
    H = n_hidden
    x = jnp.asarray(sequences, jnp.float32).reshape(B, seq_len, -1)   # (T=B, N=seq_len, F)
    T, N, F = x.shape
    x_flat = x.reshape(T * N, F)                                       # time-major flat rows

    wx0 = _wt(params["w_ih_l0"])                                       # (F, 4H)
    wh0 = _wt(params["w_hh_l0"])                                       # (H, 4H)
    b0 = jnp.asarray(params["b_ih_l0"] + params["b_hh_l0"], jnp.float32).reshape(1, 4 * H)
    wx1 = _wt(params["w_ih_l1"])                                       # (H, 4H)
    wh1 = _wt(params["w_hh_l1"])                                       # (H, 4H)
    b1 = jnp.asarray(params["b_ih_l1"] + params["b_hh_l1"], jnp.float32).reshape(1, 4 * H)

    lin_w = jnp.asarray(params["lin_w"], jnp.float32).T                # (H, O)
    lin_b = jnp.asarray(params["lin_b"], jnp.float32).reshape(1, -1)   # (1, O)
    O = lin_w.shape[1]

    t_blk = _pick_t_block(T)
    blk_rows = t_blk * N
    grid = (T // t_blk,)

    def full_spec(shape):
        return pl.BlockSpec(shape, lambda i: (0,) * len(shape))

    kernel = functools.partial(fused_lstm_kernel, t_blk=t_blk, n_rows=N, hid=H)

    y_flat = pl.pallas_call(
        kernel,
        out_shape=jax.ShapeDtypeStruct((T * N, O), jnp.float32),
        grid_spec=pltpu.PrefetchScalarGridSpec(
            num_scalar_prefetch=0,
            grid=grid,
            in_specs=[
                pl.BlockSpec((blk_rows, F), lambda i: (i, 0)),   # x tiled over time
                full_spec((F, 4 * H)),                           # wx0 (resident)
                full_spec((H, 4 * H)),                           # wh0
                full_spec((1, 4 * H)),                           # b0
                full_spec((H, 4 * H)),                           # wx1
                full_spec((H, 4 * H)),                           # wh1
                full_spec((1, 4 * H)),                           # b1
                full_spec((H, O)),                               # lin_w
                full_spec((1, O)),                               # lin_b
            ],
            out_specs=pl.BlockSpec((blk_rows, O), lambda i: (i, 0)),
            scratch_shapes=[
                pltpu.VMEM((blk_rows, 4 * H), jnp.float32),      # hoisted x@Wx0 block
                pltpu.VMEM((blk_rows, H), jnp.float32),          # h1 stash for batched head
                pltpu.VMEM((4, N, H), jnp.float32),              # h0,c0,h1,c1 carry
            ],
        ),
        compiler_params=pltpu.CompilerParams(
            dimension_semantics=("arbitrary",)),                 # serial recurrence over time
    )(x_flat, wx0, wh0, b0, wx1, wh1, b1, lin_w, lin_b)

    # lstm_out.view(seq_len, B, H) is a pure contiguous reinterpretation and the
    # Linear acts on the last dim, so reshaping the flat (T*N, O) result to
    # (seq_len, B, O) reproduces y_pred exactly.
    return y_flat.reshape(seq_len, B, O)


# ---------------------------------------------------------------------------
# Pure-JAX reference (correctness check only)
# ---------------------------------------------------------------------------
def ref_forward(sequences, params, *, n_hidden, seq_len, n_layers=2):
    B = sequences.shape[0]
    H = n_hidden
    x = sequences.reshape(B, seq_len, -1)
    for layer in range(n_layers):
        w_ih = params[f"w_ih_l{layer}"]
        w_hh = params[f"w_hh_l{layer}"]
        b = params[f"b_ih_l{layer}"] + params[f"b_hh_l{layer}"]

        def step(carry, xt):
            h, c = carry
            gates = xt @ w_ih.T + h @ w_hh.T + b
            i = jax.nn.sigmoid(gates[:, 0:H])
            f = jax.nn.sigmoid(gates[:, H:2 * H])
            g = jnp.tanh(gates[:, 2 * H:3 * H])
            o = jax.nn.sigmoid(gates[:, 3 * H:4 * H])
            c = f * c + i * g
            h = o * jnp.tanh(c)
            return (h, c), h

        init = (jnp.zeros((seq_len, H), jnp.float32), jnp.zeros((seq_len, H), jnp.float32))
        _, x = jax.lax.scan(step, init, x)
    out = x.reshape(seq_len, B, H).reshape(-1, H) @ params["lin_w"].T + params["lin_b"]
    return out.reshape(seq_len, B, 2)


# ---------------------------------------------------------------------------
# Deterministic parameter init (PyTorch-style uniform(-1/sqrt(H), 1/sqrt(H)))
# ---------------------------------------------------------------------------
def init_params(key, n_features, n_hidden, n_layers):
    params = {}
    stdv = 1.0 / jnp.sqrt(n_hidden)
    for layer in range(n_layers):
        in_sz = n_features if layer == 0 else n_hidden
        key, k1, k2, k3, k4 = jax.random.split(key, 5)
        params[f"w_ih_l{layer}"] = jax.random.uniform(k1, (4 * n_hidden, in_sz), jnp.float32, -stdv, stdv)
        params[f"w_hh_l{layer}"] = jax.random.uniform(k2, (4 * n_hidden, n_hidden), jnp.float32, -stdv, stdv)
        params[f"b_ih_l{layer}"] = jax.random.uniform(k3, (4 * n_hidden,), jnp.float32, -stdv, stdv)
        params[f"b_hh_l{layer}"] = jax.random.uniform(k4, (4 * n_hidden,), jnp.float32, -stdv, stdv)
    key, k5, k6 = jax.random.split(key, 3)
    lin_std = 1.0 / jnp.sqrt(n_hidden)
    params["lin_w"] = jax.random.uniform(k5, (2, n_hidden), jnp.float32, -lin_std, lin_std)
    params["lin_b"] = jax.random.uniform(k6, (2,), jnp.float32, -lin_std, lin_std)
    return params


if __name__ == "__main__":
    n_features, n_hidden, seq_len, n_layers = 4, 32, 8, 2
    batch = 2  # len(sequences) -> the LSTM time dimension

    key = jax.random.PRNGKey(0)
    key, pkey, xkey = jax.random.split(key, 3)
    params = init_params(pkey, n_features, n_hidden, n_layers)
    sequences = jax.random.normal(xkey, (batch, seq_len, n_features), jnp.float32)

    fwd = jax.jit(functools.partial(lstm_model_forward, n_hidden=n_hidden,
                                    seq_len=seq_len, n_layers=n_layers))
    y = jax.block_until_ready(fwd(sequences, params))

    y_ref = ref_forward(sequences, params, n_hidden=n_hidden, seq_len=seq_len, n_layers=n_layers)
    assert y.shape == (seq_len, batch, 2), y.shape
    err = float(jnp.max(jnp.abs(y - y_ref)))
    assert jnp.allclose(y, y_ref, atol=1e-4, rtol=1e-4), err

    print("KERNEL_OK")
</pallas_src>

<mosaic_0001>
module attributes {stable_mosaic.version = 11 : i64} {
  func.func @fused_lstm_kernel(%arg0: i32, %arg1: memref<16x4xf32, #tpu.memory_space<vmem>>, %arg2: memref<4x128xf32, #tpu.memory_space<vmem>>, %arg3: memref<32x128xf32, #tpu.memory_space<vmem>>, %arg4: memref<1x128xf32, #tpu.memory_space<vmem>>, %arg5: memref<32x128xf32, #tpu.memory_space<vmem>>, %arg6: memref<32x128xf32, #tpu.memory_space<vmem>>, %arg7: memref<1x128xf32, #tpu.memory_space<vmem>>, %arg8: memref<32x2xf32, #tpu.memory_space<vmem>>, %arg9: memref<1x2xf32, #tpu.memory_space<vmem>>, %arg10: memref<16x2xf32, #tpu.memory_space<vmem>>, %arg11: memref<16x128xf32, #tpu.memory_space<vmem>>, %arg12: memref<16x32xf32, #tpu.memory_space<vmem>>, %arg13: memref<4x8x32xf32, #tpu.memory_space<vmem>>) attributes {dimension_semantics = [#tpu.dimension_semantics<arbitrary>], iteration_bounds = array<i64: 1>, scalar_prefetch = 0 : i64, scratch_operands = 3 : i64, tpu.core_type = #tpu.core_type<tc>, window_params = [{transform_indices = @transform_0, window_bounds = array<i64: 16, 4>}, {pipeline_mode = #tpu.pipeline_mode<synchronous>, transform_indices = @transform_1, window_bounds = array<i64: 4, 128>}, {pipeline_mode = #tpu.pipeline_mode<synchronous>, transform_indices = @transform_2, window_bounds = array<i64: 32, 128>}, {pipeline_mode = #tpu.pipeline_mode<synchronous>, transform_indices = @transform_3, window_bounds = array<i64: 1, 128>}, {pipeline_mode = #tpu.pipeline_mode<synchronous>, transform_indices = @transform_4, window_bounds = array<i64: 32, 128>}, {pipeline_mode = #tpu.pipeline_mode<synchronous>, transform_indices = @transform_5, window_bounds = array<i64: 32, 128>}, {pipeline_mode = #tpu.pipeline_mode<synchronous>, transform_indices = @transform_6, window_bounds = array<i64: 1, 128>}, {pipeline_mode = #tpu.pipeline_mode<synchronous>, transform_indices = @transform_7, window_bounds = array<i64: 32, 2>}, {pipeline_mode = #tpu.pipeline_mode<synchronous>, transform_indices = @transform_8, window_bounds = array<i64: 1, 2>}, {transform_indices = @transform_9, window_bounds = array<i64: 16, 2>}]} {
    %c0_i32 = arith.constant 0 : i32
    %0 = arith.cmpi eq, %arg0, %c0_i32 : i32
    %1 = arith.extui %0 : i1 to i32
    %c0_i32_0 = arith.constant 0 : i32
    %2 = arith.cmpi ne, %1, %c0_i32_0 : i32
    scf.if %2 {
      %cst_94 = arith.constant 0.000000e+00 : f32
      %191 = vector.broadcast %cst_94 : f32 to vector<4x8x32xf32>
      %c0_95 = arith.constant 0 : index
      %c0_96 = arith.constant 0 : index
      %c0_97 = arith.constant 0 : index
      %192 = vector.load %arg13[%c0_95, %c0_96, %c0_97] : memref<4x8x32xf32, #tpu.memory_space<vmem>>, vector<4x8x32xf32>
      tpu.vector_store %arg13[%c0_95, %c0_96, %c0_97], %191 {strides = array<i32>} : memref<4x8x32xf32, #tpu.memory_space<vmem>>, vector<4x8x32xf32>,
    } else {
    }
    %c0 = arith.constant 0 : index
    %c0_1 = arith.constant 0 : index
    %3 = vector.load %arg1[%c0, %c0_1] : memref<16x4xf32, #tpu.memory_space<vmem>>, vector<16x4xf32>
    %c0_2 = arith.constant 0 : index
    %c0_3 = arith.constant 0 : index
    %4 = vector.load %arg2[%c0_2, %c0_3] : memref<4x128xf32, #tpu.memory_space<vmem>>, vector<4x128xf32>
    %cst = arith.constant dense<0.000000e+00> : vector<16x128xf32>
    %5 = tpu.matmul %3, %4, %cst {dimension_numbers = #tpu.dot_dimension_numbers<[1], [0], [0], [1], [0, 0, 1, 1], [], []>} : vector<16x4xf32>, vector<4x128xf32>, vector<16x128xf32> -> vector<16x128xf32>
    %c0_4 = arith.constant 0 : index
    %c0_5 = arith.constant 0 : index
    %6 = vector.load %arg4[%c0_4, %c0_5] : memref<1x128xf32, #tpu.memory_space<vmem>>, vector<1x128xf32>
    %7 = vector.broadcast %6 : vector<1x128xf32> to vector<16x128xf32>
    %8 = arith.addf %5, %7 : vector<16x128xf32>
    %c0_6 = arith.constant 0 : index
    %c0_7 = arith.constant 0 : index
    %9 = vector.load %arg11[%c0_6, %c0_7] : memref<16x128xf32, #tpu.memory_space<vmem>>, vector<16x128xf32>
    tpu.vector_store %arg11[%c0_6, %c0_7], %8 {strides = array<i32>} : memref<16x128xf32, #tpu.memory_space<vmem>>, vector<16x128xf32>,
    %c0_8 = arith.constant 0 : index
    %c0_9 = arith.constant 0 : index
    %10 = vector.load %arg3[%c0_8, %c0_9] : memref<32x128xf32, #tpu.memory_space<vmem>>, vector<32x128xf32>
    %c0_10 = arith.constant 0 : index
    %c0_11 = arith.constant 0 : index
    %11 = vector.load %arg5[%c0_10, %c0_11] : memref<32x128xf32, #tpu.memory_space<vmem>>, vector<32x128xf32>
    %c0_12 = arith.constant 0 : index
    %c0_13 = arith.constant 0 : index
    %12 = vector.load %arg6[%c0_12, %c0_13] : memref<32x128xf32, #tpu.memory_space<vmem>>, vector<32x128xf32>
    %c0_14 = arith.constant 0 : index
    %c0_15 = arith.constant 0 : index
    %13 = vector.load %arg7[%c0_14, %c0_15] : memref<1x128xf32, #tpu.memory_space<vmem>>, vector<1x128xf32>
    %c0_16 = arith.constant 0 : index
    %c0_17 = arith.constant 0 : index
    %c0_18 = arith.constant 0 : index
    %14 = vector.load %arg13[%c0_16, %c0_17, %c0_18] : memref<4x8x32xf32, #tpu.memory_space<vmem>>, vector<1x8x32xf32>
    %15 = vector.shape_cast %14 : vector<1x8x32xf32> to vector<8x32xf32>
    %c1 = arith.constant 1 : index
    %c0_19 = arith.constant 0 : index
    %c0_20 = arith.constant 0 : index
    %16 = vector.load %arg13[%c1, %c0_19, %c0_20] : memref<4x8x32xf32, #tpu.memory_space<vmem>>, vector<1x8x32xf32>
    %17 = vector.shape_cast %16 : vector<1x8x32xf32> to vector<8x32xf32>
    %c2 = arith.constant 2 : index
    %c0_21 = arith.constant 0 : index
    %c0_22 = arith.constant 0 : index
    %18 = vector.load %arg13[%c2, %c0_21, %c0_22] : memref<4x8x32xf32, #tpu.memory_space<vmem>>, vector<1x8x32xf32>
    %19 = vector.shape_cast %18 : vector<1x8x32xf32> to vector<8x32xf32>
    %c3 = arith.constant 3 : index
    %c0_23 = arith.constant 0 : index
    %c0_24 = arith.constant 0 : index
    %20 = vector.load %arg13[%c3, %c0_23, %c0_24] : memref<4x8x32xf32, #tpu.memory_space<vmem>>, vector<1x8x32xf32>
    %21 = vector.shape_cast %20 : vector<1x8x32xf32> to vector<8x32xf32>
    %c0_i32_25 = arith.constant 0 : i32
    %c8_i32 = arith.constant 8 : i32
    %22 = arith.muli %c0_i32_25, %c8_i32 : i32
    %23 = tpu.assume_multiple %22, 8 : i32
    %24 = arith.index_cast %23 : i32 to index
    %c0_26 = arith.constant 0 : index
    %25 = vector.load %arg11[%24, %c0_26] : memref<16x128xf32, #tpu.memory_space<vmem>>, vector<8x128xf32>
    %cst_27 = arith.constant dense<0.000000e+00> : vector<8x128xf32>
    %26 = tpu.matmul %15, %10, %cst_27 {dimension_numbers = #tpu.dot_dimension_numbers<[1], [0], [0], [1], [0, 0, 1, 1], [], []>} : vector<8x32xf32>, vector<32x128xf32>, vector<8x128xf32> -> vector<8x128xf32>
    %27 = arith.addf %25, %26 : vector<8x128xf32>
    %28 = vector.extract_strided_slice %27 {offsets = [0, 0], sizes = [8, 32], strides = [1, 1]} : vector<8x128xf32> to vector<8x32xf32>
    %cst_28 = arith.constant 5.000000e-01 : f32
    %29 = vector.broadcast %cst_28 : f32 to vector<8x32xf32>
    %30 = arith.mulf %29, %28 : vector<8x32xf32>
    %31 = math.tanh %30 : vector<8x32xf32>
    %cst_29 = arith.constant 5.000000e-01 : f32
    %32 = vector.broadcast %cst_29 : f32 to vector<8x32xf32>
    %33 = arith.mulf %32, %31 : vector<8x32xf32>
    %cst_30 = arith.constant 5.000000e-01 : f32
    %34 = vector.broadcast %cst_30 : f32 to vector<8x32xf32>
    %35 = arith.addf %33, %34 : vector<8x32xf32>
    %36 = vector.extract_strided_slice %27 {offsets = [0, 32], sizes = [8, 32], strides = [1, 1]} : vector<8x128xf32> to vector<8x32xf32>
    %cst_31 = arith.constant 5.000000e-01 : f32
    %37 = vector.broadcast %cst_31 : f32 to vector<8x32xf32>
    %38 = arith.mulf %37, %36 : vector<8x32xf32>
    %39 = math.tanh %38 : vector<8x32xf32>
    %cst_32 = arith.constant 5.000000e-01 : f32
    %40 = vector.broadcast %cst_32 : f32 to vector<8x32xf32>
    %41 = arith.mulf %40, %39 : vector<8x32xf32>
    %cst_33 = arith.constant 5.000000e-01 : f32
    %42 = vector.broadcast %cst_33 : f32 to vector<8x32xf32>
    %43 = arith.addf %41, %42 : vector<8x32xf32>
    %44 = vector.extract_strided_slice %27 {offsets = [0, 64], sizes = [8, 32], strides = [1, 1]} : vector<8x128xf32> to vector<8x32xf32>
    %45 = math.tanh %44 : vector<8x32xf32>
    %46 = vector.extract_strided_slice %27 {offsets = [0, 96], sizes = [8, 32], strides = [1, 1]} : vector<8x128xf32> to vector<8x32xf32>
    %cst_34 = arith.constant 5.000000e-01 : f32
    %47 = vector.broadcast %cst_34 : f32 to vector<8x32xf32>
    %48 = arith.mulf %47, %46 : vector<8x32xf32>
    %49 = math.tanh %48 : vector<8x32xf32>
    %cst_35 = arith.constant 5.000000e-01 : f32
    %50 = vector.broadcast %cst_35 : f32 to vector<8x32xf32>
    %51 = arith.mulf %50, %49 : vector<8x32xf32>
    %cst_36 = arith.constant 5.000000e-01 : f32
    %52 = vector.broadcast %cst_36 : f32 to vector<8x32xf32>
    %53 = arith.addf %51, %52 : vector<8x32xf32>
    %54 = arith.mulf %43, %17 : vector<8x32xf32>
    %55 = arith.mulf %35, %45 : vector<8x32xf32>
    %56 = arith.addf %54, %55 : vector<8x32xf32>
    %57 = math.tanh %56 : vector<8x32xf32>
    %58 = arith.mulf %53, %57 : vector<8x32xf32>
    %cst_37 = arith.constant dense<0.000000e+00> : vector<8x128xf32>
    %59 = tpu.matmul %58, %11, %cst_37 {dimension_numbers = #tpu.dot_dimension_numbers<[1], [0], [0], [1], [0, 0, 1, 1], [], []>} : vector<8x32xf32>, vector<32x128xf32>, vector<8x128xf32> -> vector<8x128xf32>
    %cst_38 = arith.constant dense<0.000000e+00> : vector<8x128xf32>
    %60 = tpu.matmul %19, %12, %cst_38 {dimension_numbers = #tpu.dot_dimension_numbers<[1], [0], [0], [1], [0, 0, 1, 1], [], []>} : vector<8x32xf32>, vector<32x128xf32>, vector<8x128xf32> -> vector<8x128xf32>
    %61 = arith.addf %59, %60 : vector<8x128xf32>
    %62 = vector.broadcast %13 : vector<1x128xf32> to vector<8x128xf32>
    %63 = arith.addf %61, %62 : vector<8x128xf32>
    %64 = vector.extract_strided_slice %63 {offsets = [0, 0], sizes = [8, 32], strides = [1, 1]} : vector<8x128xf32> to vector<8x32xf32>
    %cst_39 = arith.constant 5.000000e-01 : f32
    %65 = vector.broadcast %cst_39 : f32 to vector<8x32xf32>
    %66 = arith.mulf %65, %64 : vector<8x32xf32>
    %67 = math.tanh %66 : vector<8x32xf32>
    %cst_40 = arith.constant 5.000000e-01 : f32
    %68 = vector.broadcast %cst_40 : f32 to vector<8x32xf32>
    %69 = arith.mulf %68, %67 : vector<8x32xf32>
    %cst_41 = arith.constant 5.000000e-01 : f32
    %70 = vector.broadcast %cst_41 : f32 to vector<8x32xf32>
    %71 = arith.addf %69, %70 : vector<8x32xf32>
    %72 = vector.extract_strided_slice %63 {offsets = [0, 32], sizes = [8, 32], strides = [1, 1]} : vector<8x128xf32> to vector<8x32xf32>
    %cst_42 = arith.constant 5.000000e-01 : f32
    %73 = vector.broadcast %cst_42 : f32 to vector<8x32xf32>
    %74 = arith.mulf %73, %72 : vector<8x32xf32>
    %75 = math.tanh %74 : vector<8x32xf32>
    %cst_43 = arith.constant 5.000000e-01 : f32
    %76 = vector.broadcast %cst_43 : f32 to vector<8x32xf32>
    %77 = arith.mulf %76, %75 : vector<8x32xf32>
    %cst_44 = arith.constant 5.000000e-01 : f32
    %78 = vector.broadcast %cst_44 : f32 to vector<8x32xf32>
    %79 = arith.addf %77, %78 : vector<8x32xf32>
    %80 = vector.extract_strided_slice %63 {offsets = [0, 64], sizes = [8, 32], strides = [1, 1]} : vector<8x128xf32> to vector<8x32xf32>
    %81 = math.tanh %80 : vector<8x32xf32>
    %82 = vector.extract_strided_slice %63 {offsets = [0, 96], sizes = [8, 32], strides = [1, 1]} : vector<8x128xf32> to vector<8x32xf32>
    %cst_45 = arith.constant 5.000000e-01 : f32
    %83 = vector.broadcast %cst_45 : f32 to vector<8x32xf32>
    %84 = arith.mulf %83, %82 : vector<8x32xf32>
    %85 = math.tanh %84 : vector<8x32xf32>
    %cst_46 = arith.constant 5.000000e-01 : f32
    %86 = vector.broadcast %cst_46 : f32 to vector<8x32xf32>
    %87 = arith.mulf %86, %85 : vector<8x32xf32>
    %cst_47 = arith.constant 5.000000e-01 : f32
    %88 = vector.broadcast %cst_47 : f32 to vector<8x32xf32>
    %89 = arith.addf %87, %88 : vector<8x32xf32>
    %90 = arith.mulf %79, %21 : vector<8x32xf32>
    %91 = arith.mulf %71, %81 : vector<8x32xf32>
    %92 = arith.addf %90, %91 : vector<8x32xf32>
    %93 = math.tanh %92 : vector<8x32xf32>
    %94 = arith.mulf %89, %93 : vector<8x32xf32>
    %95 = arith.index_cast %23 : i32 to index
    %c0_48 = arith.constant 0 : index
    %96 = vector.load %arg12[%95, %c0_48] : memref<16x32xf32, #tpu.memory_space<vmem>>, vector<8x32xf32>
    tpu.vector_store %arg12[%95, %c0_48], %94 {strides = array<i32>} : memref<16x32xf32, #tpu.memory_space<vmem>>, vector<8x32xf32>,
    %c1_i32 = arith.constant 1 : i32
    %c8_i32_49 = arith.constant 8 : i32
    %97 = arith.muli %c1_i32, %c8_i32_49 : i32
    %98 = tpu.assume_multiple %97, 8 : i32
    %99 = arith.index_cast %98 : i32 to index
    %c0_50 = arith.constant 0 : index
    %100 = vector.load %arg11[%99, %c0_50] : memref<16x128xf32, #tpu.memory_space<vmem>>, vector<8x128xf32>
    %cst_51 = arith.constant dense<0.000000e+00> : vector<8x128xf32>
    %101 = tpu.matmul %58, %10, %cst_51 {dimension_numbers = #tpu.dot_dimension_numbers<[1], [0], [0], [1], [0, 0, 1, 1], [], []>} : vector<8x32xf32>, vector<32x128xf32>, vector<8x128xf32> -> vector<8x128xf32>
    %102 = arith.addf %100, %101 : vector<8x128xf32>
    %103 = vector.extract_strided_slice %102 {offsets = [0, 0], sizes = [8, 32], strides = [1, 1]} : vector<8x128xf32> to vector<8x32xf32>
    %cst_52 = arith.constant 5.000000e-01 : f32
    %104 = vector.broadcast %cst_52 : f32 to vector<8x32xf32>
    %105 = arith.mulf %104, %103 : vector<8x32xf32>
    %106 = math.tanh %105 : vector<8x32xf32>
    %cst_53 = arith.constant 5.000000e-01 : f32
    %107 = vector.broadcast %cst_53 : f32 to vector<8x32xf32>
    %108 = arith.mulf %107, %106 : vector<8x32xf32>
    %cst_54 = arith.constant 5.000000e-01 : f32
    %109 = vector.broadcast %cst_54 : f32 to vector<8x32xf32>
    %110 = arith.addf %108, %109 : vector<8x32xf32>
    %111 = vector.extract_strided_slice %102 {offsets = [0, 32], sizes = [8, 32], strides = [1, 1]} : vector<8x128xf32> to vector<8x32xf32>
    %cst_55 = arith.constant 5.000000e-01 : f32
    %112 = vector.broadcast %cst_55 : f32 to vector<8x32xf32>
    %113 = arith.mulf %112, %111 : vector<8x32xf32>
    %114 = math.tanh %113 : vector<8x32xf32>
    %cst_56 = arith.constant 5.000000e-01 : f32
    %115 = vector.broadcast %cst_56 : f32 to vector<8x32xf32>
    %116 = arith.mulf %115, %114 : vector<8x32xf32>
    %cst_57 = arith.constant 5.000000e-01 : f32
    %117 = vector.broadcast %cst_57 : f32 to vector<8x32xf32>
    %118 = arith.addf %116, %117 : vector<8x32xf32>
    %119 = vector.extract_strided_slice %102 {offsets = [0, 64], sizes = [8, 32], strides = [1, 1]} : vector<8x128xf32> to vector<8x32xf32>
    %120 = math.tanh %119 : vector<8x32xf32>
    %121 = vector.extract_strided_slice %102 {offsets = [0, 96], sizes = [8, 32], strides = [1, 1]} : vector<8x128xf32> to vector<8x32xf32>
    %cst_58 = arith.constant 5.000000e-01 : f32
    %122 = vector.broadcast %cst_58 : f32 to vector<8x32xf32>
    %123 = arith.mulf %122, %121 : vector<8x32xf32>
    %124 = math.tanh %123 : vector<8x32xf32>
    %cst_59 = arith.constant 5.000000e-01 : f32
    %125 = vector.broadcast %cst_59 : f32 to vector<8x32xf32>
    %126 = arith.mulf %125, %124 : vector<8x32xf32>
    %cst_60 = arith.constant 5.000000e-01 : f32
    %127 = vector.broadcast %cst_60 : f32 to vector<8x32xf32>
    %128 = arith.addf %126, %127 : vector<8x32xf32>
    %129 = arith.mulf %118, %56 : vector<8x32xf32>
    %130 = arith.mulf %110, %120 : vector<8x32xf32>
    %131 = arith.addf %129, %130 : vector<8x32xf32>
    %132 = math.tanh %131 : vector<8x32xf32>
    %133 = arith.mulf %128, %132 : vector<8x32xf32>
    %cst_61 = arith.constant dense<0.000000e+00> : vector<8x128xf32>
    %134 = tpu.matmul %133, %11, %cst_61 {dimension_numbers = #tpu.dot_dimension_numbers<[1], [0], [0], [1], [0, 0, 1, 1], [], []>} : vector<8x32xf32>, vector<32x128xf32>, vector<8x128xf32> -> vector<8x128xf32>
    %cst_62 = arith.constant dense<0.000000e+00> : vector<8x128xf32>
    %135 = tpu.matmul %94, %12, %cst_62 {dimension_numbers = #tpu.dot_dimension_numbers<[1], [0], [0], [1], [0, 0, 1, 1], [], []>} : vector<8x32xf32>, vector<32x128xf32>, vector<8x128xf32> -> vector<8x128xf32>
    %136 = arith.addf %134, %135 : vector<8x128xf32>
    %137 = vector.broadcast %13 : vector<1x128xf32> to vector<8x128xf32>
    %138 = arith.addf %136, %137 : vector<8x128xf32>
    %139 = vector.extract_strided_slice %138 {offsets = [0, 0], sizes = [8, 32], strides = [1, 1]} : vector<8x128xf32> to vector<8x32xf32>
    %cst_63 = arith.constant 5.000000e-01 : f32
    %140 = vector.broadcast %cst_63 : f32 to vector<8x32xf32>
    %141 = arith.mulf %140, %139 : vector<8x32xf32>
    %142 = math.tanh %141 : vector<8x32xf32>
    %cst_64 = arith.constant 5.000000e-01 : f32
    %143 = vector.broadcast %cst_64 : f32 to vector<8x32xf32>
    %144 = arith.mulf %143, %142 : vector<8x32xf32>
    %cst_65 = arith.constant 5.000000e-01 : f32
    %145 = vector.broadcast %cst_65 : f32 to vector<8x32xf32>
    %146 = arith.addf %144, %145 : vector<8x32xf32>
    %147 = vector.extract_strided_slice %138 {offsets = [0, 32], sizes = [8, 32], strides = [1, 1]} : vector<8x128xf32> to vector<8x32xf32>
    %cst_66 = arith.constant 5.000000e-01 : f32
    %148 = vector.broadcast %cst_66 : f32 to vector<8x32xf32>
    %149 = arith.mulf %148, %147 : vector<8x32xf32>
    %150 = math.tanh %149 : vector<8x32xf32>
    %cst_67 = arith.constant 5.000000e-01 : f32
    %151 = vector.broadcast %cst_67 : f32 to vector<8x32xf32>
    %152 = arith.mulf %151, %150 : vector<8x32xf32>
    %cst_68 = arith.constant 5.000000e-01 : f32
    %153 = vector.broadcast %cst_68 : f32 to vector<8x32xf32>
    %154 = arith.addf %152, %153 : vector<8x32xf32>
    %155 = vector.extract_strided_slice %138 {offsets = [0, 64], sizes = [8, 32], strides = [1, 1]} : vector<8x128xf32> to vector<8x32xf32>
    %156 = math.tanh %155 : vector<8x32xf32>
    %157 = vector.extract_strided_slice %138 {offsets = [0, 96], sizes = [8, 32], strides = [1, 1]} : vector<8x128xf32> to vector<8x32xf32>
    %cst_69 = arith.constant 5.000000e-01 : f32
    %158 = vector.broadcast %cst_69 : f32 to vector<8x32xf32>
    %159 = arith.mulf %158, %157 : vector<8x32xf32>
    %160 = math.tanh %159 : vector<8x32xf32>
    %cst_70 = arith.constant 5.000000e-01 : f32
    %161 = vector.broadcast %cst_70 : f32 to vector<8x32xf32>
    %162 = arith.mulf %161, %160 : vector<8x32xf32>
    %cst_71 = arith.constant 5.000000e-01 : f32
    %163 = vector.broadcast %cst_71 : f32 to vector<8x32xf32>
    %164 = arith.addf %162, %163 : vector<8x32xf32>
    %165 = arith.mulf %154, %92 : vector<8x32xf32>
    %166 = arith.mulf %146, %156 : vector<8x32xf32>
    %167 = arith.addf %165, %166 : vector<8x32xf32>
    %168 = math.tanh %167 : vector<8x32xf32>
    %169 = arith.mulf %164, %168 : vector<8x32xf32>
    %170 = arith.index_cast %98 : i32 to index
    %c0_72 = arith.constant 0 : index
    %171 = vector.load %arg12[%170, %c0_72] : memref<16x32xf32, #tpu.memory_space<vmem>>, vector<8x32xf32>
    tpu.vector_store %arg12[%170, %c0_72], %169 {strides = array<i32>} : memref<16x32xf32, #tpu.memory_space<vmem>>, vector<8x32xf32>,
    %c2_i32 = arith.constant 2 : i32
    %c0_73 = arith.constant 0 : index
    %c0_74 = arith.constant 0 : index
    %c0_75 = arith.constant 0 : index
    %172 = vector.load %arg13[%c0_73, %c0_74, %c0_75] : memref<4x8x32xf32, #tpu.memory_space<vmem>>, vector<1x8x32xf32>
    %173 = vector.shape_cast %172 : vector<1x8x32xf32> to vector<8x32xf32>
    %174 = vector.shape_cast %133 : vector<8x32xf32> to vector<1x8x32xf32>
    tpu.vector_store %arg13[%c0_73, %c0_74, %c0_75], %174 {strides = array<i32>} : memref<4x8x32xf32, #tpu.memory_space<vmem>>, vector<1x8x32xf32>,
    %c1_76 = arith.constant 1 : index
    %c0_77 = arith.constant 0 : index
    %c0_78 = arith.constant 0 : index
    %175 = vector.load %arg13[%c1_76, %c0_77, %c0_78] : memref<4x8x32xf32, #tpu.memory_space<vmem>>, vector<1x8x32xf32>
    %176 = vector.shape_cast %175 : vector<1x8x32xf32> to vector<8x32xf32>
    %177 = vector.shape_cast %131 : vector<8x32xf32> to vector<1x8x32xf32>
    tpu.vector_store %arg13[%c1_76, %c0_77, %c0_78], %177 {strides = array<i32>} : memref<4x8x32xf32, #tpu.memory_space<vmem>>, vector<1x8x32xf32>,
    %c2_79 = arith.constant 2 : index
    %c0_80 = arith.constant 0 : index
    %c0_81 = arith.constant 0 : index
    %178 = vector.load %arg13[%c2_79, %c0_80, %c0_81] : memref<4x8x32xf32, #tpu.memory_space<vmem>>, vector<1x8x32xf32>
    %179 = vector.shape_cast %178 : vector<1x8x32xf32> to vector<8x32xf32>
    %180 = vector.shape_cast %169 : vector<8x32xf32> to vector<1x8x32xf32>
    tpu.vector_store %arg13[%c2_79, %c0_80, %c0_81], %180 {strides = array<i32>} : memref<4x8x32xf32, #tpu.memory_space<vmem>>, vector<1x8x32xf32>,
    %c3_82 = arith.constant 3 : index
    %c0_83 = arith.constant 0 : index
    %c0_84 = arith.constant 0 : index
    %181 = vector.load %arg13[%c3_82, %c0_83, %c0_84] : memref<4x8x32xf32, #tpu.memory_space<vmem>>, vector<1x8x32xf32>
    %182 = vector.shape_cast %181 : vector<1x8x32xf32> to vector<8x32xf32>
    %183 = vector.shape_cast %167 : vector<8x32xf32> to vector<1x8x32xf32>
    tpu.vector_store %arg13[%c3_82, %c0_83, %c0_84], %183 {strides = array<i32>} : memref<4x8x32xf32, #tpu.memory_space<vmem>>, vector<1x8x32xf32>,
    %c0_85 = arith.constant 0 : index
    %c0_86 = arith.constant 0 : index
    %184 = vector.load %arg12[%c0_85, %c0_86] : memref<16x32xf32, #tpu.memory_space<vmem>>, vector<16x32xf32>
    %c0_87 = arith.constant 0 : index
    %c0_88 = arith.constant 0 : index
    %185 = vector.load %arg8[%c0_87, %c0_88] : memref<32x2xf32, #tpu.memory_space<vmem>>, vector<32x2xf32>
    %cst_89 = arith.constant dense<0.000000e+00> : vector<16x2xf32>
    %186 = tpu.matmul %184, %185, %cst_89 {dimension_numbers = #tpu.dot_dimension_numbers<[1], [0], [0], [1], [0, 0, 1, 1], [], []>} : vector<16x32xf32>, vector<32x2xf32>, vector<16x2xf32> -> vector<16x2xf32>
    %c0_90 = arith.constant 0 : index
    %c0_91 = arith.constant 0 : index
    %187 = vector.load %arg9[%c0_90, %c0_91] : memref<1x2xf32, #tpu.memory_space<vmem>>, vector<1x2xf32>
    %188 = vector.broadcast %187 : vector<1x2xf32> to vector<16x2xf32>
    %189 = arith.addf %186, %188 : vector<16x2xf32>
    %c0_92 = arith.constant 0 : index
    %c0_93 = arith.constant 0 : index
    %190 = vector.load %arg10[%c0_92, %c0_93] : memref<16x2xf32, #tpu.memory_space<vmem>>, vector<16x2xf32>
    tpu.vector_store %arg10[%c0_92, %c0_93], %189 {strides = array<i32>} : memref<16x2xf32, #tpu.memory_space<vmem>>, vector<16x2xf32>,
    return
  }
  func.func @transform_0(%arg0: i32) -> (i32, i32) {
    %c0_i32 = arith.constant 0 : i32
    %c0_i32_0 = arith.constant 0 : i32
    return %arg0, %c0_i32 : i32, i32
  }
  func.func @transform_1(%arg0: i32) -> (i32, i32) {
    %c0_i32 = arith.constant 0 : i32
    %c0_i32_0 = arith.constant 0 : i32
    %c0_i32_1 = arith.constant 0 : i32
    return %c0_i32, %c0_i32_0 : i32, i32
  }
  func.func @transform_2(%arg0: i32) -> (i32, i32) {
    %c0_i32 = arith.constant 0 : i32
    %c0_i32_0 = arith.constant 0 : i32
    %c0_i32_1 = arith.constant 0 : i32
    return %c0_i32, %c0_i32_0 : i32, i32
  }
  func.func @transform_3(%arg0: i32) -> (i32, i32) {
    %c0_i32 = arith.constant 0 : i32
    %c0_i32_0 = arith.constant 0 : i32
    %c0_i32_1 = arith.constant 0 : i32
    return %c0_i32, %c0_i32_0 : i32, i32
  }
  func.func @transform_4(%arg0: i32) -> (i32, i32) {
    %c0_i32 = arith.constant 0 : i32
    %c0_i32_0 = arith.constant 0 : i32
    %c0_i32_1 = arith.constant 0 : i32
    return %c0_i32, %c0_i32_0 : i32, i32
  }
  func.func @transform_5(%arg0: i32) -> (i32, i32) {
    %c0_i32 = arith.constant 0 : i32
    %c0_i32_0 = arith.constant 0 : i32
    %c0_i32_1 = arith.constant 0 : i32
    return %c0_i32, %c0_i32_0 : i32, i32
  }
  func.func @transform_6(%arg0: i32) -> (i32, i32) {
    %c0_i32 = arith.constant 0 : i32
    %c0_i32_0 = arith.constant 0 : i32
    %c0_i32_1 = arith.constant 0 : i32
    return %c0_i32, %c0_i32_0 : i32, i32
  }
  func.func @transform_7(%arg0: i32) -> (i32, i32) {
    %c0_i32 = arith.constant 0 : i32
    %c0_i32_0 = arith.constant 0 : i32
    %c0_i32_1 = arith.constant 0 : i32
    return %c0_i32, %c0_i32_0 : i32, i32
  }
  func.func @transform_8(%arg0: i32) -> (i32, i32) {
    %c0_i32 = arith.constant 0 : i32
    %c0_i32_0 = arith.constant 0 : i32
    %c0_i32_1 = arith.constant 0 : i32
    return %c0_i32, %c0_i32_0 : i32, i32
  }
  func.func @transform_9(%arg0: i32) -> (i32, i32) {
    %c0_i32 = arith.constant 0 : i32
    %c0_i32_0 = arith.constant 0 : i32
    return %arg0, %c0_i32 : i32, i32
  }
}

</mosaic_0001>

<bundles_post_ra>
// kernel: lstm_model_forward.1
= control target key start
LH: loop header
LB: loop body
LE: loop exit
PB: predicated region body
PF: predicated region fallthrough
CT: control target
= control target key end

     0   :  { %vm58_vm0 = vcmask 1043456   ;;  %vm51_vm1 = vcmask 31744   ;;  %v1041_v0 = vmov 0.0|0.0   ;;  %vm36_vm2 = vcmask 261120   ;;  %s1044_s22 = smov 64   ;;  %s1045_s23 = smov 32   ;;  %s1256_s2 = inlined_call_operand.vmem [shape: f32[32,128], index: 2, kind: input, shape index: {}]   ;;  %s1257_s1 = inlined_call_operand.vmem [shape: f32[4,128], index: 1, kind: input, shape index: {}]   ;;  %s1258_s0 = inlined_call_operand.vmem [shape: f32[16,4], index: 0, kind: input, shape index: {}]   ;;  %s1259_s3 = inlined_call_operand.vmem [shape: f32[1,128], index: 3, kind: input, shape index: {}]   ;;  %s1260_s5 = inlined_call_operand.vmem [shape: f32[32,128], index: 5, kind: input, shape index: {}]   ;;  %s1261_s4 = inlined_call_operand.vmem [shape: f32[32,128], index: 4, kind: input, shape index: {}]   ;;  %s1262_s6 = inlined_call_operand.vmem [shape: f32[1,128], index: 6, kind: input, shape index: {}]   ;;  %s1263_s7 = inlined_call_operand.vmem [shape: f32[32,2], index: 7, kind: input, shape index: {}]   ;;  %s1264_s8 = inlined_call_operand.vmem [shape: f32[1,2], index: 8, kind: input, shape index: {}]   ;;  %s1265_s9 = inlined_call_operand.vmem [shape: f32[16,2], index: 9, kind: output, shape index: {}]  }
   0x1   :  { %967 = vmatprep.subr.bf16.mxu1 %v1041_v0  ;;  %v139_v1 = vld [vmem:[%s1256_s2] sm:$0xff]  ;;  %v140_v2 = vld [vmem:[%s1256_s2 + $0x8] sm:$0xff]  ;;  %v141_v7 = vld [vmem:[%s1256_s2 + $0x10] sm:$0xff]  ;;  %vm1042_vm3 = vmmov 0   ;;  %v1043_v8 = vmov 0.0   ;;  %vm825_vm4 = vcmask 15360  }
   0x2   :  { %v43_v3 = vld [vmem:[%s1257_s1] sm:$0xf]  ;;  %v1107_v4 = vpack.c.bf16 %v140_v2, %v139_v1  ;;  %v42_v6 = vld [vmem:[%s1258_s0 + $0x8] sm:$0xff]  ;;  %898 = vmatprep.mubr.msk.f32.mxu1 %vm1042_vm3, %v1043_v8  ;;  %37 = vst.msk [vmem:[#allocation4] sm:$0xff] %vm36_vm2, %v1043_v8  ;;  %38 = vst.msk [vmem:[#allocation4 + $0x8] sm:$0xff] %vm36_vm2, %v1043_v8 }
   0x3   :  { %885 = vmatprep.subr.msk.mxu0 %vm58_vm0, %v43_v3  ;;  %v41_v5 = vld [vmem:[%s1258_s0] sm:$0xff]  ;;  %39 = vst.msk [vmem:[#allocation4 + $0x10] sm:$0xff] %vm36_vm2, %v1043_v8  ;;  %40 = vst.msk [vmem:[#allocation4 + $0x18] sm:$0xff] %vm36_vm2, %v1043_v8  ;;  %v142_v9 = vld [vmem:[%s1256_s2 + $0x18] sm:$0xff] }
   0x4   :  { %886 = vmatpush3.msk.msra.mxu0 %vm58_vm0, %v43_v3  ;;  %887 = vmatprep.mubr.msk.f32.mxu0 %vm51_vm1, %v41_v5  ;;  %v1136_v10 = vpack.c.bf16 %v142_v9, %v141_v7  ;;  %v832_v12 = vld [vmem:[%s1259_s3] ss:$0 sm:$0xff]  ;;  %v148_v33 = vld [vmem:[%s1260_s5 + $0x8] sm:$0xff]  ;;  %v149_v34 = vld [vmem:[%s1260_s5 + $0x10] sm:$0xff] }
   0x5   :  { %969 = vmatpush3.bf16.msra.mxu1 %v1107_v4  ;;  %888 = vmatmul.mubr.msk.f32.vlgmr.msra.gmra.mrb[0].mxu0 %vm51_vm1, %v42_v6  ;;  %v147_v32 = vld [vmem:[%s1260_s5] sm:$0xff]  ;;  %v150_v36 = vld [vmem:[%s1260_s5 + $0x18] sm:$0xff]  ;;  %v144_v38 = vld [vmem:[%s1261_s4 + $0x8] sm:$0xff] }
   0x6   :  { %970 = vmatprep.subr.bf16.mxu1 %v1041_v0  ;;  %973 = vmatprep.subr.bf16.mxu0 %v1041_v0  ;;  %v974_v35 = vpack.c.bf16 %v148_v33, %v147_v32  ;;  %v143_v37 = vld [vmem:[%s1261_s4] sm:$0xff]  ;;  %v145_v40 = vld [vmem:[%s1261_s4 + $0x10] sm:$0xff]  ;;  %v146_v41 = vld [vmem:[%s1261_s4 + $0x18] sm:$0xff]  ;;  %v977_v42 = vpack.c.bf16 %v150_v36, %v149_v34 }
   0x7   :  { %909 = vmatprep.mubr.msk.f32.mxu0 %vm1042_vm3, %v1043_v8  ;;  %v980_v39 = vpack.c.bf16 %v144_v38, %v143_v37  ;;  %v983_v43 = vpack.c.bf16 %v146_v41, %v145_v40  ;;  %v1206_v51 = vld [vmem:[%s1262_s6] ss:$0 sm:$0xff]  ;;  %s1046_s6 = smov 96  }
   0x8   :  { %975 = vmatpush3.bf16.msra.mxu0 %v974_v35 }
   0x9   :  { %972 = vmatpush3.bf16.msra.mxu1 %v1136_v10  ;;  %v152_v11 = vld [vmem:[#allocation4] sm:$0xff]  ;;  %v154_v21 = vld [vmem:[#allocation4 + $0x8] sm:$0xff]  ;;  %976 = vmatprep.subr.bf16.mxu0 %v1041_v0 }
   0xa   :  { %979 = vmatprep.subr.bf16.mxu1 %v1041_v0  ;;  %v156_v44 = vld [vmem:[#allocation4 + $0x10] sm:$0xff]  ;;  %v158_v61 = vld [vmem:[#allocation4 + $0x18] sm:$0xff] }
   0xc   :  { %899 = vmatmul.mubr.msk.f32.vlgmr.msra.gmra.mrb[0].mxu1 %vm36_vm2, %v152_v11  ;;  %978 = vmatpush3.bf16.msra.mxu0 %v977_v42 }
   0xd   :  { %920 = vmatprep.mubr.msk.f32.mxu1 %vm1042_vm3, %v1043_v8  ;;  %981 = vmatpush3.bf16.msra.mxu1 %v980_v39 }
   0xe   :  { %982 = vmatprep.subr.bf16.mxu1 %v1041_v0  ;;  %985 = vmatprep.subr.bf16.mxu0 %v1041_v0 }
   0xf   :  { %910 = vmatmul.mubr.msk.f32.vlgmr.msra.gmra.mrb[2].mxu0 %vm36_vm2, %v156_v44  ;;  %v734_v44 = vld [vmem:[%s1263_s7 + $0x8] sm:$0xff] }
  0x10   :  { %987 = vmatpush3.bf16.msra.mxu0 %v1107_v4  ;;  %931 = vmatprep.mubr.msk.f32.mxu0 %vm1042_vm3, %v1043_v8 }
  0x11   :  { %984 = vmatpush3.bf16.msra.mxu1 %v983_v43  ;;  %988 = vmatprep.subr.bf16.mxu0 %v1041_v0 }
  0x12   :  { %991 = vmatprep.subr.bf16.mxu1 %v1041_v0 }
  0x14   :  { %990 = vmatpush3.bf16.msra.mxu0 %v1136_v10 }
  0x15   :  { %997 = vmatprep.subr.bf16.mxu0 %v1041_v0 }
  0xd8   :  { %v889_v13 = vpop.f32.mrb[0].mxu0 }
  0xd9   :  { %v1150_v14 = vadd.f32 %v889_v13, %v832_v12  ;;  %v128_v15 = vpop.f32.mrb[1].mxu0 }
  0xda   :  { %v129_v16 = vadd.f32 %v832_v12, %v128_v15 }
  0xdf   :  { %v230_v17 = vpop.f32.mrb[0].mxu1 }
  0xe0   :  { %v234_v18 = vadd.f32 %v230_v17, %v129_v16  ;;  %v900_v19 = vpop.f32.mrb[1].mxu1 }
  0xe2   :  { %1017 = vtanh.f32 %v234_v18  ;;  %v235_v22 = vmul.f32 0.5, %v234_v18  ;;  %v330_v48 = vpop.f32.mrb[2].mxu0 }
  0xe3   :  { %v911_v49 = vpop.f32.mrb[3].mxu0 }
  0xe4   :  { %1019 = vtanh.f32 %v235_v22 }
  0xec   :  { %v1018_v20 = vpop.eup %1017 }
  0xed   :  { %246 = vrot.lane.b32.xlu0 %v1018_v20, %s1044_s22 }
  0xee   :  { %v1020_v23 = vpop.eup %1019 }
  0xef   :  { %v237_v24 = vmul.f32 0.5, %v1020_v23 }
  0xf1   :  { %241 = vrot.lane.b32.xlu0 %v154_v21, %s1045_s23  ;;  %v238_v25 = vadd.f32 0.5, %v237_v24 }
 0x15f   :  { %v247_v26 = vpop.permute.xlu0 %246 }
 0x160   :  { %v249_v27 = vmul.f32 %v247_v26, %v238_v25 }
 0x162   :  { %251 = vrot.lane.b32.xlu1 %v249_v27, %s1045_s23 }
 0x163   :  { %v242_v28 = vpop.permute.xlu0 %241 }
 0x164   :  { %v244_v29 = vmul.f32 %v242_v28, %v238_v25 }
 0x1d4   :  { %v252_v30 = vpop.permute.xlu1 %251 }
 0x1d5   :  { %v1155_v31 = vadd.f32 %v252_v30, %v244_v29 }
 0x1d7   :  { %1021 = vtanh.f32 %v1155_v31 }
 0x1e1   :  { %v1022_v45 = vpop.eup %1021 }
 0x1e2   :  { %257 = vrot.lane.b32.xlu1 %v1022_v45, %s1044_s22 }
 0x254   :  { %v258_v46 = vpop.permute.xlu1 %257 }
 0x255   :  { %v260_v47 = vmul.f32 %v258_v46, %v238_v25  ;;  %v735_v46 = vld [vmem:[%s1263_s7 + $0x10] sm:$0xff] }
 0x257   :  { %335 = vrot.lane.b32.xlu0 %v260_v47, %s1045_s23  ;;  %v736_v47 = vld [vmem:[%s1263_s7 + $0x18] sm:$0xff] }
 0x2c9   :  { %v336_v50 = vpop.permute.xlu0 %335 }
 0x2ca   :  { %921 = vmatmul.mubr.msk.f32.vlgmr.msra.gmra.mrb[2].mxu1 %vm36_vm2, %v336_v50  ;;  %932 = vmatmul.mubr.msk.f32.vlgmr.msra.gmra.mrb[4].mxu0 %vm36_vm2, %v336_v50 }
 0x2cb   :  { %999 = vmatpush3.bf16.msra.mxu0 %v980_v39  ;;  %993 = vmatpush3.bf16.msra.mxu1 %v974_v35 }
 0x2cc   :  { %1000 = vmatprep.subr.bf16.mxu0 %v1041_v0  ;;  %994 = vmatprep.subr.bf16.mxu1 %v1041_v0 }
 0x2cd   :  { %953 = vmatprep.mubr.msk.f32.mxu0 %vm1042_vm3, %v1043_v8  ;;  %942 = vmatprep.mubr.msk.f32.mxu1 %vm1042_vm3, %v1043_v8 }
 0x2cf   :  { %1002 = vmatpush3.bf16.msra.mxu0 %v983_v43  ;;  %996 = vmatpush3.bf16.msra.mxu1 %v977_v42  ;;  %v733_v43 = vld [vmem:[%s1263_s7] sm:$0xff] }
 0x2d0   :  { %v1003_v45 = vpack.c.bf16 %v734_v44, %v733_v43 }
 0x2d2   :  { %1004 = vmatprep.subr.bf16.mxu1 %v1003_v45 }
 0x39d   :  { %v405_v52 = vpop.f32.mrb[2].mxu1  ;;  %v515_v53 = vpop.f32.mrb[4].mxu0 }
 0x39e   :  { %v406_v54 = vadd.f32 %v405_v52, %v330_v48  ;;  %v519_v55 = vadd.f32 %v515_v53, %v1150_v14  ;;  %v922_v56 = vpop.f32.mrb[3].mxu1  ;;  %v933_v57 = vpop.f32.mrb[5].mxu0  ;;  %v1007_v48 = vpack.c.bf16 %v736_v47, %v735_v46 }
 0x3a0   :  { %v415_v58 = vadd.f32 %v1206_v51, %v406_v54  ;;  %1023 = vtanh.f32 %v519_v55  ;;  %v520_v62 = vmul.f32 0.5, %v519_v55  ;;  %v843_v55 = vld [vmem:[%s1264_s8] ss:$0 sm:$0xff] }
 0x3a2   :  { %1025 = vtanh.f32 %v415_v58  ;;  %v416_v63 = vmul.f32 0.5, %v415_v58 }
 0x3a3   :  { %1027 = vtanh.f32 %v520_v62 }
 0x3a4   :  { %1029 = vtanh.f32 %v416_v63 }
 0x3aa   :  { %v1024_v59 = vpop.eup %1023 }
 0x3ab   :  { %527 = vrot.lane.b32.xlu0 %v1024_v59, %s1044_s22 }
 0x3ac   :  { %v1026_v60 = vpop.eup %1025 }
 0x3ad   :  { %427 = vrot.lane.b32.xlu1 %v1026_v60, %s1044_s22  ;;  %v1028_v0 = vpop.eup %1027 }
 0x3ae   :  { %v1030_v1 = vpop.eup %1029  ;;  %v522_v2 = vmul.f32 0.5, %v1028_v0 }
 0x3af   :  { %v418_v3 = vmul.f32 0.5, %v1030_v1 }
 0x3b0   :  { %v523_v4 = vadd.f32 0.5, %v522_v2 }
 0x3b1   :  { %422 = vrot.lane.b32.xlu1 %v158_v61, %s1045_s23  ;;  %v419_v7 = vadd.f32 0.5, %v418_v3 }
 0x3b2   :  { %v525_v11 = vmul.f32 %v523_v4, %v1155_v31 }
 0x41d   :  { %v528_v5 = vpop.permute.xlu0 %527 }
 0x41e   :  { %v530_v6 = vmul.f32 %v528_v5, %v523_v4 }
 0x41f   :  { %v428_v8 = vpop.permute.xlu1 %427 }
 0x420   :  { %v430_v9 = vmul.f32 %v428_v8, %v419_v7  ;;  %532 = vrot.lane.b32.xlu1 %v530_v6, %s1045_s23 }
 0x422   :  { %432 = vrot.lane.b32.xlu0 %v430_v9, %s1045_s23 }
 0x423   :  { %v423_v10 = vpop.permute.xlu1 %422 }
 0x424   :  { %v425_v13 = vmul.f32 %v423_v10, %v419_v7 }
 0x492   :  { %v533_v12 = vpop.permute.xlu1 %532 }
 0x493   :  { %v535_v14 = vadd.f32 %v533_v12, %v525_v11 }
 0x494   :  { %v433_v15 = vpop.permute.xlu0 %432 }
 0x495   :  { %1031 = vtanh.f32 %v535_v14  ;;  %v435_v16 = vadd.f32 %v433_v15, %v425_v13 }
 0x497   :  { %1033 = vtanh.f32 %v435_v16 }
 0x49f   :  { %v1032_v17 = vpop.eup %1031 }
 0x4a0   :  { %538 = vrot.lane.b32.xlu1 %v1032_v17, %s1044_s22 }
 0x4a1   :  { %v1034_v18 = vpop.eup %1033 }
 0x4a2   :  { %438 = vrot.lane.b32.xlu0 %v1034_v18, %s1044_s22 }
 0x512   :  { %v539_v19 = vpop.permute.xlu1 %538 }
 0x513   :  { %v541_v20 = vmul.f32 %v539_v19, %v523_v4 }
 0x514   :  { %v439_v21 = vpop.permute.xlu0 %438 }
 0x515   :  { %v441_v22 = vmul.f32 %v439_v21, %v419_v7  ;;  %615 = vrot.lane.b32.xlu1 %v541_v20, %s1045_s23 }
 0x517   :  { %443 = vrot.lane.b32.xlu0 %v441_v22, %s1045_s23 }
 0x587   :  { %v616_v23 = vpop.permute.xlu1 %615 }
 0x588   :  { %719 = vst.msk [vmem:[#allocation4] sm:$0xff] %vm36_vm2, %v616_v23  ;;  %954 = vmatmul.mubr.msk.f32.vlgmr.msra.gmra.mrb[6].mxu0 %vm36_vm2, %v616_v23 }
 0x589   :  { %v444_v24 = vpop.permute.xlu0 %443 }
 0x58a   :  { %446 = vst.msk [vmem:[#allocation3] sm:$0xff] %vm36_vm2, %v444_v24  ;;  %943 = vmatmul.mubr.msk.f32.vlgmr.msra.gmra.mrb[4].mxu1 %vm36_vm2, %v444_v24 }
 0x58b   :  { %1006 = vmatpush3.bf16.msra.mxu1 %v1003_v45 }
 0x58c   :  { %1008 = vmatprep.subr.bf16.mxu1 %v1007_v48 }
 0x58f   :  { %1010 = vmatpush3.bf16.msra.mxu1 %v1007_v48 }
 0x591   :  { %v731_v25 = vld [vmem:[#allocation3] sm:$0xff] }
 0x592   :  { %964 = vmatprep.mubr.msk.f32.mxu1 %vm36_vm2, %v731_v25 }
 0x65b   :  { %v685_v26 = vpop.f32.mrb[6].mxu0 }
 0x65c   :  { %v955_v27 = vpop.f32.mrb[7].mxu0 }
 0x65d   :  { %v610_v28 = vpop.f32.mrb[4].mxu1 }
 0x65e   :  { %v686_v29 = vadd.f32 %v685_v26, %v610_v28  ;;  %v944_v30 = vpop.f32.mrb[5].mxu1 }
 0x660   :  { %v689_v31 = vadd.f32 %v1206_v51, %v686_v29 }
 0x662   :  { %1035 = vtanh.f32 %v689_v31  ;;  %v690_v33 = vmul.f32 0.5, %v689_v31 }
 0x664   :  { %1037 = vtanh.f32 %v690_v33 }
 0x66c   :  { %v1036_v32 = vpop.eup %1035 }
 0x66d   :  { %697 = vrot.lane.b32.xlu0 %v1036_v32, %s1044_s22 }
 0x66e   :  { %v1038_v34 = vpop.eup %1037 }
 0x66f   :  { %v692_v35 = vmul.f32 0.5, %v1038_v34 }
 0x671   :  { %v693_v36 = vadd.f32 0.5, %v692_v35 }
 0x673   :  { %v695_v39 = vmul.f32 %v693_v36, %v435_v16 }
 0x6df   :  { %v698_v37 = vpop.permute.xlu0 %697 }
 0x6e0   :  { %v700_v38 = vmul.f32 %v698_v37, %v693_v36 }
 0x6e2   :  { %702 = vrot.lane.b32.xlu1 %v700_v38, %s1045_s23 }
 0x754   :  { %v703_v40 = vpop.permute.xlu1 %702 }
 0x755   :  { %v705_v41 = vadd.f32 %v703_v40, %v695_v39 }
 0x757   :  { %1039 = vtanh.f32 %v705_v41 }
 0x761   :  { %v1040_v42 = vpop.eup %1039 }
 0x762   :  { %708 = vrot.lane.b32.xlu0 %v1040_v42, %s1044_s22 }
 0x766   :  { %721 = vrot.lane.b32.xlu0 %v535_v14, %s1046_s6 }
 0x7d4   :  { %v709_v49 = vpop.permute.xlu0 %708 }
 0x7d5   :  { %v711_v50 = vmul.f32 %v709_v49, %v693_v36 }
 0x7d7   :  { %713 = vrot.lane.b32.xlu1 %v711_v50, %s1045_s23 }
 0x7d8   :  { %v722_v51 = vpop.permute.xlu0 %721 }
 0x7d9   :  { %724 = vst.msk [vmem:[#allocation4 + $0x8] sm:$0xff] %vm36_vm2, %v722_v51 }
 0x7db   :  { %727 = vrot.lane.b32.xlu1 %v705_v41, %s1046_s6 }
 0x849   :  { %v714_v52 = vpop.permute.xlu1 %713 }
 0x84a   :  { %717 = vst.msk [vmem:[#allocation3 + $0x8] sm:$0xff] %vm36_vm2, %v714_v52  ;;  %725 = vst.msk [vmem:[#allocation4 + $0x10] sm:$0xff] %vm36_vm2, %v714_v52 }
 0x84d   :  { %v728_v53 = vpop.permute.xlu1 %727 }
 0x84e   :  { %730 = vst.msk [vmem:[#allocation4 + $0x18] sm:$0xff] %vm36_vm2, %v728_v53 }
 0x851   :  { %v732_v54 = vld [vmem:[#allocation3 + $0x8] sm:$0xff] }
 0x852   :  { %965 = vmatmul.mubr.msk.f32.vlgmr.msra.gmra.mrb[6].mxu1 %vm36_vm2, %v732_v54 }
 0x925   :  { %v966_v56 = vpop.f32.mrb[6].mxu1 }
 0x926   :  { %v822_v57 = vadd.f32 %v966_v56, %v843_v55  ;;  %v816_v58 = vpop.f32.mrb[7].mxu1 }
 0x927   :  { %v817_v59 = vadd.f32 %v843_v55, %v816_v58 }
 0x928   :  { %827 = vst.msk [vmem:[%s1265_s9 + $0x8] sm:$0xff] %vm825_vm4, %v822_v57 }
 0x929   :  { %826 = vst.msk [vmem:[%s1265_s9] sm:$0xff] %vm825_vm4, %v817_v59 }

</bundles_post_ra>
